<compile_context>
chip_gen: v6e
topology: v6e:2x2x1
jax: 0.10.0
libtpu: 0.0.40
codegen_flags: <defaults>
</compile_context>

<pallas_src>
import functools

import jax
import jax.numpy as jnp
from jax.experimental import pallas as pl
from jax.experimental.pallas import tpu as pltpu


def _round_up(x, m):
    return ((x + m - 1) // m) * m


def _cdiv(a, b):
    return (a + b - 1) // b


def _vmem_budget():
    """Return (physical VMEM bytes per core, has-2-tensorcores?) with safe fallbacks."""
    vmem_phys = 64 << 20          # conservative default (v7x per-TC VMEM)
    two_core = True
    try:
        kind = jax.devices()[0].device_kind.lower()
        if "v5" in kind or "v6" in kind:
            vmem_phys, two_core = 128 << 20, False
    except Exception:
        pass
    try:  # refine with the trace-time hardware query when available
        v = int(pltpu.get_tpu_info().vmem_capacity_bytes)
        if v > 0:
            vmem_phys = min(vmem_phys, v)
    except Exception:
        pass
    return vmem_phys, two_core


# ----------------------------------------------------------------------------
# Kernels
# ----------------------------------------------------------------------------
def ffn_resident_kernel(x_ref, w1_ref, b1_ref, w2_ref, b2_ref, o_ref):
    # Weight-resident path: W1/W2/b1/b2 BlockSpecs are grid-constant, so the
    # weights live in VMEM and are DMA'd exactly once for the whole call.
    h = jnp.dot(x_ref[...], w1_ref[...], preferred_element_type=jnp.float32)
    h = jnp.maximum(h + b1_ref[...].astype(jnp.float32), 0.0)
    out = jnp.dot(h.astype(w2_ref.dtype), w2_ref[...],
                  preferred_element_type=jnp.float32)
    # Dropout(p=0.1) in eval mode == identity.
    o_ref[...] = (out + b2_ref[...].astype(jnp.float32)).astype(o_ref.dtype)


def ffn_stream_kernel(x_ref, w1_ref, b1_ref, w2_ref, b2_ref, o_ref, acc_ref):
    # Streaming path: grid = (row_tiles, H // th), hidden axis last
    # ("arbitrary"), fp32 accumulator resident across it.
    h_idx = pl.program_id(1)

    @pl.when(h_idx == 0)
    def _():
        # Fold b2 into the accumulator init (added exactly once, no finalize add).
        acc_ref[...] = jnp.broadcast_to(
            b2_ref[...].astype(jnp.float32), acc_ref.shape)

    h = jnp.dot(x_ref[...], w1_ref[...], preferred_element_type=jnp.float32)
    h = jnp.maximum(h + b1_ref[...].astype(jnp.float32), 0.0)
    acc_ref[...] += jnp.dot(h.astype(w2_ref.dtype), w2_ref[...],
                            preferred_element_type=jnp.float32)

    @pl.when(h_idx == pl.num_programs(1) - 1)
    def _():
        # Dropout(p=0.1) in eval mode == identity.
        o_ref[...] = acc_ref[...].astype(o_ref.dtype)


# ----------------------------------------------------------------------------
# Wrapper
# ----------------------------------------------------------------------------
@functools.partial(jax.jit,
                   static_argnames=("force_stream", "cast_operands_to_bf16"))
def feed_forward(x, w1, b1, w2, b2, *, force_stream=False,
                 cast_operands_to_bf16=False):
    """x: (B, T, E) -> (B, T, E). w1: (E, 4E), b1: (4E,), w2: (4E, E), b2: (E,)."""
    B, T, E = x.shape
    H = w1.shape[1]
    N = B * T
    out_dtype = x.dtype

    # Optional mixed precision: bf16 MXU operands, fp32 accumulation, fp32 out.
    # Off by default to preserve the fp32 PyTorch module numerics.
    if cast_operands_to_bf16 and x.dtype == jnp.float32:
        x = x.astype(jnp.bfloat16)
        w1 = w1.astype(jnp.bfloat16)
        w2 = w2.astype(jnp.bfloat16)

    ix = jnp.dtype(x.dtype).itemsize        # kernel x-operand itemsize
    ox = jnp.dtype(out_dtype).itemsize      # output itemsize
    iw = jnp.dtype(w1.dtype).itemsize       # weight itemsize

    # ---- per-generation VMEM budget / tile targets --------------------------
    vmem_phys, two_core = _vmem_budget()
    small_vmem = vmem_phys <= (64 << 20)                       # v7x-class
    vmem_cap = min((48 << 20) if small_vmem else (100 << 20),
                   int(vmem_phys * 0.8))
    tm_target = 512 if small_vmem else 1024

    # Row tile: generation target, bounded by the row count (sublane granule 8).
    tm = min(tm_target, _round_up(N, 8))
    # v7x megacore: make sure the "parallel" row axis has >= 2 tiles.
    if two_core and N > 16 and _cdiv(N, tm) < 2:
        tm = max(8, _round_up(_cdiv(N, 2), 8))

    # ---- VMEM cost models (include the in-kernel fp32 intermediates) --------
    def _resident_bytes(tm_):
        weights = 2 * E * H * iw * 2                  # W1+W2 (buffered)
        biases = 2 * (H + E) * iw
        io = tm_ * E * (ix + ox) * 2                  # x + out tiles (dbl-buf)
        interm = tm_ * H * 4 + tm_ * H * iw + tm_ * E * 4
        return weights + biases + io + interm

    def _stream_bytes(tm_, th_):
        weights = 2 * E * th_ * iw * 2                # W1/W2 chunks (dbl-buf)
        biases = th_ * iw * 2 + E * iw * 2
        io = tm_ * E * (ix + ox) * 2
        acc = tm_ * E * 4
        interm = tm_ * th_ * 4 + tm_ * th_ * iw + tm_ * E * 4
        return weights + biases + io + acc + interm

    # ---- weight-resident fast path if W1+W2 (+tiles) fit the VMEM budget ----
    use_resident = False
    if not force_stream:
        for cand in sorted({tm, 512, 384, 256}, reverse=True):
            if 8 <= cand <= tm and _resident_bytes(cand) <= vmem_cap:
                tm, use_resident = cand, True
                break

    th = H
    if not use_resident:
        if force_stream and H % 128 == 0:
            th = 128      # deliberately small chunk: exercises multi-step accumulation
        else:
            for cand in (512, 256, 128):
                if H % cand == 0 and _stream_bytes(tm, cand) <= vmem_cap:
                    th = cand
                    break
            while tm > 256 and _stream_bytes(tm, th) > vmem_cap:
                tm = max(256, _round_up(tm // 2, 8))

    n_pad = _round_up(N, tm)
    n_row_tiles = n_pad // tm

    # ---- operand prep (pad/slice only when N % tm != 0) ---------------------
    x2 = x.reshape(N, E)
    if n_pad != N:
        x2 = jnp.pad(x2, ((0, n_pad - N), (0, 0)))
    b1_2 = b1.reshape(1, H)
    b2_2 = b2.reshape(1, E)

    # ---- compiler params / cost hint ----------------------------------------
    est_bytes = _resident_bytes(tm) if use_resident else _stream_bytes(tm, th)
    compiler_params = pltpu.CompilerParams(
        dimension_semantics=(("parallel",) if use_resident
                             else ("parallel", "arbitrary")),
        vmem_limit_bytes=int(min(vmem_cap, max(2 * est_bytes, 32 << 20))),
    )
    weight_bytes = (1 if use_resident else n_row_tiles) * 2 * E * H * iw
    cost = pl.CostEstimate(
        flops=4 * n_pad * E * H,
        transcendentals=0,
        bytes_accessed=int(n_pad * E * (ix + ox) + weight_bytes + (H + E) * iw),
    )

    if use_resident:
        out = pl.pallas_call(
            ffn_resident_kernel,
            out_shape=jax.ShapeDtypeStruct((n_pad, E), out_dtype),
            grid_spec=pltpu.PrefetchScalarGridSpec(
                num_scalar_prefetch=0,
                grid=(n_row_tiles,),
                in_specs=[
                    pl.BlockSpec((tm, E), lambda i: (i, 0)),    # x rows
                    pl.BlockSpec((E, H), lambda i: (0, 0)),     # W1 (resident)
                    pl.BlockSpec((1, H), lambda i: (0, 0)),     # b1 (resident)
                    pl.BlockSpec((H, E), lambda i: (0, 0)),     # W2 (resident)
                    pl.BlockSpec((1, E), lambda i: (0, 0)),     # b2 (resident)
                ],
                out_specs=pl.BlockSpec((tm, E), lambda i: (i, 0)),
            ),
            compiler_params=compiler_params,
            cost_estimate=cost,
        )(x2, w1, b1_2, w2, b2_2)
    else:
        out = pl.pallas_call(
            ffn_stream_kernel,
            out_shape=jax.ShapeDtypeStruct((n_pad, E), out_dtype),
            grid_spec=pltpu.PrefetchScalarGridSpec(
                num_scalar_prefetch=0,
                grid=(n_row_tiles, H // th),
                in_specs=[
                    pl.BlockSpec((tm, E), lambda i, h: (i, 0)),   # x rows
                    pl.BlockSpec((E, th), lambda i, h: (0, h)),   # W1[:, chunk]
                    pl.BlockSpec((1, th), lambda i, h: (0, h)),   # b1[chunk]
                    pl.BlockSpec((th, E), lambda i, h: (h, 0)),   # W2[chunk, :]
                    pl.BlockSpec((1, E), lambda i, h: (0, 0)),    # b2
                ],
                out_specs=pl.BlockSpec((tm, E), lambda i, h: (i, 0)),
                scratch_shapes=[pltpu.VMEM((tm, E), jnp.float32)],
            ),
            compiler_params=compiler_params,
            cost_estimate=cost,
        )(x2, w1, b1_2, w2, b2_2)

    if n_pad != N:
        out = out[:N]
    return out.reshape(B, T, E)


def init_params(key, embed_size, dtype=jnp.float32):
    """Deterministic init mirroring nn.Linear's U(-1/sqrt(fan_in), 1/sqrt(fan_in))."""
    hidden = 4 * embed_size
    k1, k2, k3, k4 = jax.random.split(key, 4)
    lim1 = 1.0 / jnp.sqrt(embed_size)
    lim2 = 1.0 / jnp.sqrt(hidden)
    w1 = jax.random.uniform(k1, (embed_size, hidden), dtype, -lim1, lim1)
    b1 = jax.random.uniform(k2, (hidden,), dtype, -lim1, lim1)
    w2 = jax.random.uniform(k3, (hidden, embed_size), dtype, -lim2, lim2)
    b2 = jax.random.uniform(k4, (embed_size,), dtype, -lim2, lim2)
    return w1, b1, w2, b2


if __name__ == "__main__":
    key = jax.random.PRNGKey(0)
    kx, kp = jax.random.split(key)

    # ---- Test 1: small demo shapes (weight-resident fast path) --------------
    B, T, E = 2, 8, 32            # batch=2, seq=8, embed=32 -> hidden=128
    x = jax.random.normal(kx, (B, T, E), jnp.float32)
    w1, b1, w2, b2 = init_params(kp, E)

    h_ref = jnp.maximum(x.reshape(-1, E) @ w1 + b1, 0.0)
    y_ref = (h_ref @ w2 + b2).reshape(B, T, E)

    y = jax.block_until_ready(feed_forward(x, w1, b1, w2, b2))
    assert jnp.allclose(y, y_ref, atol=1e-5, rtol=1e-5), "resident path mismatch"

    # ---- Test 2: force the streaming/accumulator path for coverage ----------
    B2, T2, E2 = 2, 64, 128       # N=128 rows, hidden=512 -> 4 H-chunks of 128
    kx2, kp2 = jax.random.split(jax.random.PRNGKey(0))
    xs = jax.random.normal(kx2, (B2, T2, E2), jnp.float32)
    w1s, b1s, w2s, b2s = init_params(kp2, E2)

    hs_ref = jnp.maximum(xs.reshape(-1, E2) @ w1s + b1s, 0.0)
    ys_ref = (hs_ref @ w2s + b2s).reshape(B2, T2, E2)

    ys = jax.block_until_ready(
        feed_forward(xs, w1s, b1s, w2s, b2s, force_stream=True))
    assert jnp.allclose(ys, ys_ref, atol=1e-4, rtol=1e-4), "stream path mismatch"

    # ---- Test 3: optional bf16-operand mixed precision (looser tolerance) ---
    yb = jax.block_until_ready(
        feed_forward(x, w1, b1, w2, b2, cast_operands_to_bf16=True))
    assert jnp.allclose(yb, y_ref, atol=3e-2, rtol=3e-2), "bf16 path mismatch"

    print("KERNEL_OK")
</pallas_src>

<mosaic_0001>
module attributes {stable_mosaic.version = 11 : i64} {
  func.func @ffn_resident_kernel(%arg0: i32, %arg1: memref<16x32xf32, #tpu.memory_space<vmem>>, %arg2: memref<32x128xf32, #tpu.memory_space<vmem>>, %arg3: memref<1x128xf32, #tpu.memory_space<vmem>>, %arg4: memref<128x32xf32, #tpu.memory_space<vmem>>, %arg5: memref<1x32xf32, #tpu.memory_space<vmem>>, %arg6: memref<16x32xf32, #tpu.memory_space<vmem>>) attributes {dimension_semantics = [#tpu.dimension_semantics<parallel>], iteration_bounds = array<i64: 1>, scalar_prefetch = 0 : i64, scratch_operands = 0 : i64, tpu.core_type = #tpu.core_type<tc>, window_params = [{transform_indices = @transform_0, window_bounds = array<i64: 16, 32>}, {pipeline_mode = #tpu.pipeline_mode<synchronous>, transform_indices = @transform_1, window_bounds = array<i64: 32, 128>}, {pipeline_mode = #tpu.pipeline_mode<synchronous>, transform_indices = @transform_2, window_bounds = array<i64: 1, 128>}, {pipeline_mode = #tpu.pipeline_mode<synchronous>, transform_indices = @transform_3, window_bounds = array<i64: 128, 32>}, {pipeline_mode = #tpu.pipeline_mode<synchronous>, transform_indices = @transform_4, window_bounds = array<i64: 1, 32>}, {transform_indices = @transform_5, window_bounds = array<i64: 16, 32>}]} {
    %c0 = arith.constant 0 : index
    %c0_0 = arith.constant 0 : index
    %0 = vector.load %arg1[%c0, %c0_0] : memref<16x32xf32, #tpu.memory_space<vmem>>, vector<16x32xf32>
    %c0_1 = arith.constant 0 : index
    %c0_2 = arith.constant 0 : index
    %1 = vector.load %arg2[%c0_1, %c0_2] : memref<32x128xf32, #tpu.memory_space<vmem>>, vector<32x128xf32>
    %cst = arith.constant dense<0.000000e+00> : vector<16x128xf32>
    %2 = tpu.matmul %0, %1, %cst {dimension_numbers = #tpu.dot_dimension_numbers<[1], [0], [0], [1], [0, 0, 1, 1], [], []>} : vector<16x32xf32>, vector<32x128xf32>, vector<16x128xf32> -> vector<16x128xf32>
    %c0_3 = arith.constant 0 : index
    %c0_4 = arith.constant 0 : index
    %3 = vector.load %arg3[%c0_3, %c0_4] : memref<1x128xf32, #tpu.memory_space<vmem>>, vector<1x128xf32>
    %4 = vector.broadcast %3 : vector<1x128xf32> to vector<16x128xf32>
    %5 = arith.addf %2, %4 : vector<16x128xf32>
    %cst_5 = arith.constant 0.000000e+00 : f32
    %6 = vector.broadcast %cst_5 : f32 to vector<16x128xf32>
    %7 = arith.maximumf %5, %6 : vector<16x128xf32>
    %c0_6 = arith.constant 0 : index
    %c0_7 = arith.constant 0 : index
    %8 = vector.load %arg4[%c0_6, %c0_7] : memref<128x32xf32, #tpu.memory_space<vmem>>, vector<128x32xf32>
    %cst_8 = arith.constant dense<0.000000e+00> : vector<16x32xf32>
    %9 = tpu.matmul %7, %8, %cst_8 {dimension_numbers = #tpu.dot_dimension_numbers<[1], [0], [0], [1], [0, 0, 1, 1], [], []>} : vector<16x128xf32>, vector<128x32xf32>, vector<16x32xf32> -> vector<16x32xf32>
    %c0_9 = arith.constant 0 : index
    %c0_10 = arith.constant 0 : index
    %10 = vector.load %arg5[%c0_9, %c0_10] : memref<1x32xf32, #tpu.memory_space<vmem>>, vector<1x32xf32>
    %11 = vector.broadcast %10 : vector<1x32xf32> to vector<16x32xf32>
    %12 = arith.addf %9, %11 : vector<16x32xf32>
    %c0_11 = arith.constant 0 : index
    %c0_12 = arith.constant 0 : index
    %13 = vector.load %arg6[%c0_11, %c0_12] : memref<16x32xf32, #tpu.memory_space<vmem>>, vector<16x32xf32>
    tpu.vector_store %arg6[%c0_11, %c0_12], %12 {strides = array<i32>} : memref<16x32xf32, #tpu.memory_space<vmem>>, vector<16x32xf32>,
    return
  }
  func.func @transform_0(%arg0: i32) -> (i32, i32) {
    %c0_i32 = arith.constant 0 : i32
    %c0_i32_0 = arith.constant 0 : i32
    return %arg0, %c0_i32 : i32, i32
  }
  func.func @transform_1(%arg0: i32) -> (i32, i32) {
    %c0_i32 = arith.constant 0 : i32
    %c0_i32_0 = arith.constant 0 : i32
    %c0_i32_1 = arith.constant 0 : i32
    return %c0_i32, %c0_i32_0 : i32, i32
  }
  func.func @transform_2(%arg0: i32) -> (i32, i32) {
    %c0_i32 = arith.constant 0 : i32
    %c0_i32_0 = arith.constant 0 : i32
    %c0_i32_1 = arith.constant 0 : i32
    return %c0_i32, %c0_i32_0 : i32, i32
  }
  func.func @transform_3(%arg0: i32) -> (i32, i32) {
    %c0_i32 = arith.constant 0 : i32
    %c0_i32_0 = arith.constant 0 : i32
    %c0_i32_1 = arith.constant 0 : i32
    return %c0_i32, %c0_i32_0 : i32, i32
  }
  func.func @transform_4(%arg0: i32) -> (i32, i32) {
    %c0_i32 = arith.constant 0 : i32
    %c0_i32_0 = arith.constant 0 : i32
    %c0_i32_1 = arith.constant 0 : i32
    return %c0_i32, %c0_i32_0 : i32, i32
  }
  func.func @transform_5(%arg0: i32) -> (i32, i32) {
    %c0_i32 = arith.constant 0 : i32
    %c0_i32_0 = arith.constant 0 : i32
    return %arg0, %c0_i32 : i32, i32
  }
}

</mosaic_0001>

<bundles_post_ra>
// kernel: feed_forward.1
= control target key start
LH: loop header
LB: loop body
LE: loop exit
PB: predicated region body
PF: predicated region fallthrough
CT: control target
= control target key end

     0   :  { %vm34_vm0 = vcmask 261120   ;;  %s445_s0 = inlined_call_operand.vmem [shape: f32[16,32], index: 0, kind: input, shape index: {}]   ;;  %s446_s1 = inlined_call_operand.vmem [shape: f32[32,128], index: 1, kind: input, shape index: {}]   ;;  %s447_s2 = inlined_call_operand.vmem [shape: f32[1,128], index: 2, kind: input, shape index: {}]   ;;  %s448_s3 = inlined_call_operand.vmem [shape: f32[128,32], index: 3, kind: input, shape index: {}]   ;;  %s449_s4 = inlined_call_operand.vmem [shape: f32[1,32], index: 4, kind: input, shape index: {}]   ;;  %s450_s5 = inlined_call_operand.hbm [shape: f32[16,32], index: 5, kind: output, shape index: {}]  }
   0x1   :  { %v26_v0 = vld [vmem:[%s446_s1 + $0x18] sm:$0xff]  ;;  %v25_v1 = vld [vmem:[%s446_s1 + $0x10] sm:$0xff]  ;;  %v21_v2 = vld [vmem:[%s445_s0] sm:$0xff] }
   0x2   :  { %262 = vmatprep.subr.mxu0 %v26_v0  ;;  %v24_v3 = vld [vmem:[%s446_s1 + $0x8] sm:$0xff]  ;;  %270 = vmatprep.mubr.msk.f32.mxu0 %vm34_vm0, %v21_v2  ;;  %v133_v4 = vld [vmem:[%s448_s3 + $0x78] sm:$0xff]  ;;  %v132_v5 = vld [vmem:[%s448_s3 + $0x70] sm:$0xff] }
   0x3   :  { %263 = vmatpush3.msra.mxu0 %v26_v0  ;;  %273 = vmatprep.subr.mxu1 %v133_v4  ;;  %v23_v6 = vld [vmem:[%s446_s1] sm:$0xff]  ;;  %v131_v7 = vld [vmem:[%s448_s3 + $0x68] sm:$0xff] }
   0x4   :  { %264 = vmatprep.subr.mxu0 %v25_v1  ;;  %274 = vmatpush3.msra.mxu1 %v133_v4  ;;  %v22_v8 = vld [vmem:[%s445_s0 + $0x8] sm:$0xff]  ;;  %v130_v9 = vld [vmem:[%s448_s3 + $0x60] sm:$0xff] }
   0x5   :  { %265 = vmatpush3.msra.mxu0 %v25_v1  ;;  %275 = vmatprep.subr.mxu1 %v132_v5 }
   0x6   :  { %266 = vmatprep.subr.mxu0 %v24_v3  ;;  %276 = vmatpush3.msra.mxu1 %v132_v5 }
   0x7   :  { %267 = vmatpush3.msra.mxu0 %v24_v3 }
   0x8   :  { %10 = vsyncpa [#allocation3], 0  ;;  %268 = vmatprep.subr.mxu0 %v23_v6  ;;  %277 = vmatprep.subr.mxu1 %v131_v7  ;;  %v129_v10 = vld [vmem:[%s448_s3 + $0x58] sm:$0xff]  ;;  %v128_v11 = vld [vmem:[%s448_s3 + $0x50] sm:$0xff] }
   0x9   :  { %269 = vmatpush3.msra.mxu0 %v23_v6  ;;  %278 = vmatpush3.msra.mxu1 %v131_v7  ;;  %v127_v12 = vld [vmem:[%s448_s3 + $0x48] sm:$0xff]  ;;  %v126_v13 = vld [vmem:[%s448_s3 + $0x40] sm:$0xff]  ;;  %v125_v14 = vld [vmem:[%s448_s3 + $0x38] sm:$0xff] }
   0xa   :  { %271 = vmatmul.mubr.msk.f32.vlgmr.msra.gmra.mxu0 %vm34_vm0, %v22_v8  ;;  %279 = vmatprep.subr.mxu1 %v130_v9  ;;  %v124_v15 = vld [vmem:[%s448_s3 + $0x30] sm:$0xff]  ;;  %v123_v16 = vld [vmem:[%s448_s3 + $0x28] sm:$0xff]  ;;  %v122_v17 = vld [vmem:[%s448_s3 + $0x20] sm:$0xff] }
   0xb   :  { %280 = vmatpush3.msra.mxu1 %v130_v9  ;;  %v121_v18 = vld [vmem:[%s448_s3 + $0x18] sm:$0xff]  ;;  %v120_v19 = vld [vmem:[%s448_s3 + $0x10] sm:$0xff]  ;;  %v119_v20 = vld [vmem:[%s448_s3 + $0x8] sm:$0xff] }
   0xc   :  { %281 = vmatprep.subr.mxu1 %v129_v10  ;;  %v118_v21 = vld [vmem:[%s448_s3] sm:$0xff]  ;;  %s333_s3 = smov [#allocation2]  }
   0xd   :  { %282 = vmatpush3.msra.mxu1 %v129_v10  ;;  %v234_v22 = vld [vmem:[%s447_s2] ss:$0 sm:$0xff]  ;;  %s223_s13 = sshll.u32 %s333_s3, 4  ;;  %s224_s13 = int_to_ptr.vmem [resolvable:$true] %s223_s13 }
   0xe   :  { %283 = vmatprep.subr.mxu1 %v128_v11  ;;  %v237_v29 = vld [vmem:[%s449_s4] ss:$0 sm:$0xff]  ;;  %s311_s2 = scalar_lea.vmem %s224_s13, 256  ;;  %p316_p1 = scmp.lt.s32.totalorder %s224_s13, %s224_s13 }
   0xf   :  { %284 = vmatpush3.msra.mxu1 %v128_v11  ;;  %p312_p0 = scmp.ne.s32.totalorder %s224_s13, %s311_s2  ;;  %p317_p2 = scmp.lt.s32.totalorder %s311_s2, %s311_s2 }
  0x10   :  { %285 = vmatprep.subr.mxu1 %v127_v12 }
  0x11   :  { %286 = vmatpush3.msra.mxu1 %v127_v12  ;;  %p318_p3 = por %p317_p2, %p316_p1 }
  0x12   :  { %287 = vmatprep.subr.mxu1 %v126_v13 }
  0x13   :  { %288 = vmatpush3.msra.mxu1 %v126_v13  ;;  %p319_p4 = pnand %p318_p3, %p312_p0 }
  0x14   :  { %289 = vmatprep.subr.mxu1 %v125_v14 }
  0x15   :  { %290 = vmatpush3.msra.mxu1 %v125_v14 }
  0x16   :  { %291 = vmatprep.subr.mxu1 %v124_v15 }
  0x17   :  { %292 = vmatpush3.msra.mxu1 %v124_v15 }
  0x18   :  { %293 = vmatprep.subr.mxu1 %v123_v16 }
  0x19   :  { %294 = vmatpush3.msra.mxu1 %v123_v16 }
  0x1a   :  { %295 = vmatprep.subr.mxu1 %v122_v17 }
  0x1b   :  { %296 = vmatpush3.msra.mxu1 %v122_v17 }
  0x1c   :  { %297 = vmatprep.subr.mxu1 %v121_v18 }
  0x1d   :  { %298 = vmatpush3.msra.mxu1 %v121_v18 }
  0x1e   :  { %299 = vmatprep.subr.mxu1 %v120_v19 }
  0x1f   :  { %300 = vmatpush3.msra.mxu1 %v120_v19 }
  0x20   :  { %301 = vmatprep.subr.mxu1 %v119_v20 }
  0x21   :  { %302 = vmatpush3.msra.mxu1 %v119_v20 }
  0x22   :  { %303 = vmatprep.subr.mxu1 %v118_v21 }
  0x23   :  { %304 = vmatpush3.msra.mxu1 %v118_v21 }
  0xca   :  { %v272_v23 = vpop.f32.mrf.mxu0 }
  0xcb   :  { %v113_v24 = vadd.f32 %v272_v23, %v234_v22 }
  0xcc   :  { %v107_v25 = vpop.f32.mrf.mxu0 }
  0xcd   :  { %v108_v26 = vadd.f32 %v234_v22, %v107_v25  ;;  %v117_v28 = vmax.f32 %v113_v24, 0.0 }
  0xcf   :  { %v116_v27 = vmax.f32 %v108_v26, 0.0 }
  0xd1   :  { %305 = vmatprep.mubr.f32.mxu1 %v116_v27 }
  0xd2   :  { %306 = vmatmul.mubr.f32.vlgmr.msra.gmra.mxu1 %v117_v28 }
 0x192   :  { %v307_v30 = vpop.f32.mrf.mxu1 }
 0x193   :  { %v213_v31 = vadd.f32 %v307_v30, %v237_v29 }
 0x194   :  { %v207_v32 = vpop.f32.mrf.mxu1 }
 0x195   :  { %217 = vst.msk [vmem:[#allocation2 + $0x8] sm:$0xff] %vm34_vm0, %v213_v31  ;;  %v208_v33 = vadd.f32 %v237_v29, %v207_v32 }
 0x197   :  { %216 = vst.msk [vmem:[#allocation2] sm:$0xff] %vm34_vm0, %v208_v33 }
 0x198   :  { %322 = shalt.err (!%p319_p4)
}
 0x199   :  { %s334_s14 = smov 128   ;;  %s335_s4 = smov 8  }
 0x19a   :  { %229 = dma.vmem_to_hbm [thread:$0]  %s224_s13, 256, %s450_s5, [#allocation3], %s334_s14, %s334_s14, %s335_s4  }
 0x19b   :  { %331 = dma.done.wait [#allocation3], 256  }
 0x19c   :  { %332 = vsyncadd [#allocation3], 4294967040 }
 0x19d   :  { %233 = vsyncpa [#allocation3], 1 }

</bundles_post_ra>
